<compile_context>
chip_gen: v5e
topology: v5e:2x2
jax: 0.10.0
libtpu: 0.0.40
codegen_flags: <defaults>
</compile_context>

<pallas_src>
import functools

import jax
import jax.numpy as jnp
from jax.experimental import pallas as pl
from jax.experimental.pallas import tpu as pltpu


# Raised scoped-VMEM limit (v5e default is only 16 MiB); comfortably below
# v7x's 64 MiB physical VMEM per TensorCore.
_VMEM_LIMIT_BYTES = 32 * 1024 * 1024
# Per-tile f32 byte budget: keeps 2 in-buffers + 2 out-buffers + intermediates
# well inside v7x's VMEM while being large enough to amortize the ~0.35 us
# per-grid-step overhead (near HBM roofline at >=512-row / multi-KiB tiles).
_TARGET_TILE_BYTES = 2 * 1024 * 1024
# Lane width used by the grouped tiny-C channels_last path.
_GROUP_LANES = 128


def _round_up(v, m):
    return ((v + m - 1) // m) * m


def _pick_tm(R, C):
    """Row-tile size: VMEM-budgeted, multiple of 8, >=2 grid steps if possible."""
    tm = (_TARGET_TILE_BYTES // (C * 4)) // 8 * 8
    tm = max(8, min(tm, 8192))
    R8 = _round_up(R, 8)
    if tm >= R8:
        if R8 > 16:
            # Split mid-sized inputs into two grid steps so the parallel grid
            # axis can be sharded across v7x's two TensorCores.
            tm = _round_up(R8 // 2, 8)
        else:
            tm = R8
    return tm


# ----------------------------------------------------------------------------
# channels_last kernel (generic): tile = (tm, C), reduce over the lane axis.
# ----------------------------------------------------------------------------
def _layernorm_cl_kernel(x_ref, w_ref, b_ref, o_ref, *, eps):
    # x_ref: (tm, C); w_ref/b_ref: (1, C) float32, broadcast over rows.
    # The last grid block may be ragged; padded rows can hold garbage
    # (possibly NaN through rsqrt) but are row-independent and masked on
    # writeback, so they never reach HBM.  Do NOT reduce across rows here.
    x = x_ref[...].astype(jnp.float32)
    mean = jnp.mean(x, axis=-1, keepdims=True)
    d = x - mean
    var = jnp.mean(d * d, axis=-1, keepdims=True)    # biased variance (torch)
    inv = jax.lax.rsqrt(var + eps)
    y = d * inv * w_ref[...] + b_ref[...]
    o_ref[...] = y.astype(o_ref.dtype)


def _layer_norm_channels_last_2d(x2d, weight, bias, eps):
    R, C = x2d.shape
    tm = _pick_tm(R, C)
    w = weight.astype(jnp.float32).reshape(1, C)
    b = bias.astype(jnp.float32).reshape(1, C)

    return pl.pallas_call(
        functools.partial(_layernorm_cl_kernel, eps=eps),
        out_shape=jax.ShapeDtypeStruct((R, C), x2d.dtype),
        grid=(pl.cdiv(R, tm),),
        in_specs=[
            pl.BlockSpec((tm, C), lambda i: (i, 0)),
            pl.BlockSpec((1, C), lambda i: (0, 0)),
            pl.BlockSpec((1, C), lambda i: (0, 0)),
        ],
        out_specs=pl.BlockSpec((tm, C), lambda i: (i, 0)),
        compiler_params=pltpu.CompilerParams(
            dimension_semantics=("parallel",),
            vmem_limit_bytes=_VMEM_LIMIT_BYTES,
        ),
    )(x2d, w, b)


# ----------------------------------------------------------------------------
# channels_last kernel (tiny C, grouped lane-dense): tile = (tm, 128), the
# per-group (size-C) mean/var reductions are one MXU matmul against a constant
# block-diagonal group-mean matrix.  Exact math, fully lane-dense DMA + stores.
# ----------------------------------------------------------------------------
def _layernorm_cl_grouped_kernel(x_ref, w_ref, b_ref, gmat_ref, o_ref, *, eps):
    # x_ref: (tm, L); w_ref/b_ref: (1, L) float32 (weight tiled g times);
    # gmat_ref: (L, L) float32 with gmat[i, j] = 1/C if i//C == j//C else 0.
    x = x_ref[...].astype(jnp.float32)
    gm = gmat_ref[...]
    mean = jnp.dot(x, gm, preferred_element_type=jnp.float32)      # group mean, broadcast
    d = x - mean
    var = jnp.dot(d * d, gm, preferred_element_type=jnp.float32)   # biased group variance
    inv = jax.lax.rsqrt(var + eps)
    y = d * inv * w_ref[...] + b_ref[...]
    o_ref[...] = y.astype(o_ref.dtype)


def _layer_norm_channels_last_grouped(x2d, weight, bias, eps):
    R, C = x2d.shape
    g = _GROUP_LANES // C
    L = g * C                                  # == 128
    Rg = R // g                                # caller guarantees R % g == 0
    x_g = x2d.reshape(Rg, L)                   # free, contiguous view

    w2 = jnp.tile(weight.astype(jnp.float32), g).reshape(1, L)
    b2 = jnp.tile(bias.astype(jnp.float32), g).reshape(1, L)
    grp = jnp.arange(L) // C
    gmat = (grp[:, None] == grp[None, :]).astype(jnp.float32) / float(C)

    tm = _pick_tm(Rg, L)
    out = pl.pallas_call(
        functools.partial(_layernorm_cl_grouped_kernel, eps=eps),
        out_shape=jax.ShapeDtypeStruct((Rg, L), x2d.dtype),
        grid=(pl.cdiv(Rg, tm),),
        in_specs=[
            pl.BlockSpec((tm, L), lambda i: (i, 0)),
            pl.BlockSpec((1, L), lambda i: (0, 0)),
            pl.BlockSpec((1, L), lambda i: (0, 0)),
            pl.BlockSpec((L, L), lambda i: (0, 0)),
        ],
        out_specs=pl.BlockSpec((tm, L), lambda i: (i, 0)),
        compiler_params=pltpu.CompilerParams(
            dimension_semantics=("parallel",),
            vmem_limit_bytes=_VMEM_LIMIT_BYTES,
        ),
    )(x_g, w2, b2, gmat)
    return out.reshape(R, C)


# ----------------------------------------------------------------------------
# channels_first kernel: tile = (1, C, thw), reduce over C on the sublane axis
# (no NCHW<->NHWC transposes, lane-dense H*W even for tiny C).
# ----------------------------------------------------------------------------
def _layernorm_cf_kernel(x_ref, w_ref, b_ref, o_ref, *, eps):
    # x_ref: (1, C, thw); w_ref/b_ref: (C, 1) float32.
    # Ragged last H*W block: padded lane columns may hold garbage but each
    # column is independent and masked on writeback.
    x = x_ref[0].astype(jnp.float32)                 # (C, thw)
    mean = jnp.mean(x, axis=0, keepdims=True)        # (1, thw)  sublane reduce
    d = x - mean
    var = jnp.mean(d * d, axis=0, keepdims=True)     # biased variance (torch)
    inv = jax.lax.rsqrt(var + eps)
    y = d * inv * w_ref[...] + b_ref[...]            # (C, thw)
    o_ref[0] = y.astype(o_ref.dtype)


def _pick_thw(HW, C):
    """H*W tile size: multiple of 128 (or the full extent), VMEM-budgeted."""
    if HW <= 128:
        return HW
    thw = (_TARGET_TILE_BYTES // (C * 4)) // 128 * 128
    thw = max(128, min(thw, 8192))
    thw = min(thw, _round_up(HW, 128))
    return thw


def _layer_norm_channels_first(x, weight, bias, eps):
    N, C, H, W = x.shape
    HW = H * W
    x3d = x.reshape(N, C, HW)                        # free, contiguous view
    thw = _pick_thw(HW, C)
    w = weight.astype(jnp.float32).reshape(C, 1)
    b = bias.astype(jnp.float32).reshape(C, 1)

    out = pl.pallas_call(
        functools.partial(_layernorm_cf_kernel, eps=eps),
        out_shape=jax.ShapeDtypeStruct((N, C, HW), x.dtype),
        grid=(N, pl.cdiv(HW, thw)),
        in_specs=[
            pl.BlockSpec((1, C, thw), lambda n, j: (n, 0, j)),
            pl.BlockSpec((C, 1), lambda n, j: (0, 0)),
            pl.BlockSpec((C, 1), lambda n, j: (0, 0)),
        ],
        out_specs=pl.BlockSpec((1, C, thw), lambda n, j: (n, 0, j)),
        compiler_params=pltpu.CompilerParams(
            dimension_semantics=("parallel", "parallel"),
            vmem_limit_bytes=_VMEM_LIMIT_BYTES,
        ),
    )(x3d, w, b)
    return out.reshape(N, C, H, W)


# ----------------------------------------------------------------------------
# Module wrapper (mirrors model/VSGNet.py::LayerNorm forward semantics).
# ----------------------------------------------------------------------------
class LayerNormPallas:
    def __init__(self, normalized_shape, eps=1e-6, data_format="channels_last"):
        if data_format not in ["channels_last", "channels_first"]:
            raise NotImplementedError
        self.C = int(normalized_shape)
        # torch init: weight = ones, bias = zeros (deterministic)
        self.weight = jnp.ones((self.C,), dtype=jnp.float32)
        self.bias = jnp.zeros((self.C,), dtype=jnp.float32)
        self.eps = float(eps)
        self.data_format = data_format

    def __call__(self, x):
        if self.data_format == "channels_last":
            orig_shape = x.shape
            x2d = x.reshape(-1, self.C)
            R = x2d.shape[0]
            use_grouped = (
                self.C < _GROUP_LANES
                and _GROUP_LANES % self.C == 0
                and R % (_GROUP_LANES // self.C) == 0
            )
            if use_grouped:
                y = _layer_norm_channels_last_grouped(
                    x2d, self.weight, self.bias, self.eps)
            else:
                y = _layer_norm_channels_last_2d(
                    x2d, self.weight, self.bias, self.eps)
            return y.reshape(orig_shape)
        else:  # channels_first: NCHW, normalize over C (axis 1) in-place layout
            return _layer_norm_channels_first(x, self.weight, self.bias, self.eps)


# ----------------------------------------------------------------------------
# Plain-JAX references
# ----------------------------------------------------------------------------
def _reference_channels_first(x, weight, bias, eps):
    u = jnp.mean(x, axis=1, keepdims=True)
    s = jnp.mean((x - u) ** 2, axis=1, keepdims=True)
    xn = (x - u) / jnp.sqrt(s + eps)
    return weight[None, :, None, None] * xn + bias[None, :, None, None]


def _reference_channels_last(x, weight, bias, eps):
    u = jnp.mean(x, axis=-1, keepdims=True)
    s = jnp.mean((x - u) ** 2, axis=-1, keepdims=True)
    xn = (x - u) / jnp.sqrt(s + eps)
    return weight * xn + bias


if __name__ == "__main__":
    key = jax.random.PRNGKey(0)
    k1, k2, k3, k4, k5 = jax.random.split(key, 5)

    # channels_first: NCHW input (small C -> sublane-reduce, lane-dense H*W)
    N, C, H, W = 2, 4, 16, 16
    x_cf = jax.random.normal(k1, (N, C, H, W), dtype=jnp.float32)
    ln_cf = LayerNormPallas(C, eps=1e-6, data_format="channels_first")
    y_cf = jax.block_until_ready(ln_cf(x_cf))
    ref_cf = _reference_channels_first(x_cf, ln_cf.weight, ln_cf.bias, ln_cf.eps)
    assert y_cf.shape == x_cf.shape and y_cf.dtype == x_cf.dtype
    assert jnp.allclose(y_cf, ref_cf, atol=1e-4, rtol=1e-4)

    # channels_first with H*W not a multiple of 128 (full-extent lane block)
    x_cf2 = jax.random.normal(k2, (2, 4, 10, 10), dtype=jnp.float32)
    y_cf2 = jax.block_until_ready(ln_cf(x_cf2))
    ref_cf2 = _reference_channels_first(x_cf2, ln_cf.weight, ln_cf.bias, ln_cf.eps)
    assert jnp.allclose(y_cf2, ref_cf2, atol=1e-4, rtol=1e-4)

    # channels_last: NHWC input, C=4 -> grouped lane-dense path (R % 32 == 0)
    x_cl = jax.random.normal(k3, (N, H, W, C), dtype=jnp.float32)
    ln_cl = LayerNormPallas(C, eps=1e-6, data_format="channels_last")
    y_cl = jax.block_until_ready(ln_cl(x_cl))
    ref_cl = _reference_channels_last(x_cl, ln_cl.weight, ln_cl.bias, ln_cl.eps)
    assert y_cl.shape == x_cl.shape and y_cl.dtype == x_cl.dtype
    assert jnp.allclose(y_cl, ref_cl, atol=1e-4, rtol=1e-4)

    # channels_last, C=4 but row count NOT divisible by the group factor
    # -> exercises the masked fallback path.
    x_cl_rag = jax.random.normal(k5, (3, 5, C), dtype=jnp.float32)
    y_cl_rag = jax.block_until_ready(ln_cl(x_cl_rag))
    ref_cl_rag = _reference_channels_last(x_cl_rag, ln_cl.weight, ln_cl.bias, ln_cl.eps)
    assert jnp.allclose(y_cl_rag, ref_cl_rag, atol=1e-4, rtol=1e-4)

    # channels_last, lane-dense C=256, ragged row count (tests masked last block)
    C2 = 256
    x_cl2 = jax.random.normal(k4, (3, 5, C2), dtype=jnp.float32)
    ln_cl2 = LayerNormPallas(C2, eps=1e-6, data_format="channels_last")
    y_cl2 = jax.block_until_ready(ln_cl2(x_cl2))
    ref_cl2 = _reference_channels_last(x_cl2, ln_cl2.weight, ln_cl2.bias, ln_cl2.eps)
    assert jnp.allclose(y_cl2, ref_cl2, atol=1e-4, rtol=1e-4)

    print("KERNEL_OK")
</pallas_src>

<mosaic_0001>
module attributes {stable_mosaic.version = 11 : i64} {
  func.func @_layernorm_cf_kernel(%arg0: i32, %arg1: i32, %arg2: memref<1x4x256xf32, #tpu.memory_space<vmem>>, %arg3: memref<4x1xf32, #tpu.memory_space<vmem>>, %arg4: memref<4x1xf32, #tpu.memory_space<vmem>>, %arg5: memref<1x4x256xf32, #tpu.memory_space<vmem>>) attributes {dimension_semantics = [#tpu.dimension_semantics<parallel>, #tpu.dimension_semantics<parallel>], iteration_bounds = array<i64: 2, 1>, scalar_prefetch = 0 : i64, scratch_operands = 0 : i64, tpu.core_type = #tpu.core_type<tc>, window_params = [{transform_indices = @transform_0, window_bounds = array<i64: 1, 4, 256>}, {pipeline_mode = #tpu.pipeline_mode<synchronous>, transform_indices = @transform_1, window_bounds = array<i64: 4, 1>}, {pipeline_mode = #tpu.pipeline_mode<synchronous>, transform_indices = @transform_2, window_bounds = array<i64: 4, 1>}, {transform_indices = @transform_3, window_bounds = array<i64: 1, 4, 256>}]} {
    %c0 = arith.constant 0 : index
    %c0_0 = arith.constant 0 : index
    %c0_1 = arith.constant 0 : index
    %0 = vector.load %arg2[%c0, %c0_0, %c0_1] : memref<1x4x256xf32, #tpu.memory_space<vmem>>, vector<1x4x256xf32>
    %1 = vector.shape_cast %0 : vector<1x4x256xf32> to vector<4x256xf32>
    %cst = arith.constant dense<0.000000e+00> : vector<256xf32>
    %2 = vector.multi_reduction <add>, %1, %cst [0] : vector<4x256xf32> to vector<256xf32>
    %3 = vector.shape_cast %2 : vector<256xf32> to vector<1x256xf32>
    %cst_2 = arith.constant 4.000000e+00 : f32
    %4 = vector.broadcast %cst_2 : f32 to vector<1x256xf32>
    %5 = arith.divf %3, %4 : vector<1x256xf32>
    %6 = vector.broadcast %5 : vector<1x256xf32> to vector<4x256xf32>
    %7 = arith.subf %1, %6 : vector<4x256xf32>
    %8 = arith.mulf %7, %7 : vector<4x256xf32>
    %cst_3 = arith.constant dense<0.000000e+00> : vector<256xf32>
    %9 = vector.multi_reduction <add>, %8, %cst_3 [0] : vector<4x256xf32> to vector<256xf32>
    %10 = vector.shape_cast %9 : vector<256xf32> to vector<1x256xf32>
    %cst_4 = arith.constant 4.000000e+00 : f32
    %11 = vector.broadcast %cst_4 : f32 to vector<1x256xf32>
    %12 = arith.divf %10, %11 : vector<1x256xf32>
    %cst_5 = arith.constant 9.99999997E-7 : f32
    %13 = vector.broadcast %cst_5 : f32 to vector<1x256xf32>
    %14 = arith.addf %12, %13 : vector<1x256xf32>
    %15 = math.rsqrt %14 : vector<1x256xf32>
    %16 = vector.broadcast %15 : vector<1x256xf32> to vector<4x256xf32>
    %17 = arith.mulf %7, %16 : vector<4x256xf32>
    %c0_6 = arith.constant 0 : index
    %c0_7 = arith.constant 0 : index
    %18 = vector.load %arg3[%c0_6, %c0_7] : memref<4x1xf32, #tpu.memory_space<vmem>>, vector<4x1xf32>
    %19 = vector.broadcast %18 : vector<4x1xf32> to vector<4x256xf32>
    %20 = arith.mulf %17, %19 : vector<4x256xf32>
    %c0_8 = arith.constant 0 : index
    %c0_9 = arith.constant 0 : index
    %21 = vector.load %arg4[%c0_8, %c0_9] : memref<4x1xf32, #tpu.memory_space<vmem>>, vector<4x1xf32>
    %22 = vector.broadcast %21 : vector<4x1xf32> to vector<4x256xf32>
    %23 = arith.addf %20, %22 : vector<4x256xf32>
    %c0_10 = arith.constant 0 : index
    %c0_11 = arith.constant 0 : index
    %c0_12 = arith.constant 0 : index
    %24 = vector.load %arg5[%c0_10, %c0_11, %c0_12] : memref<1x4x256xf32, #tpu.memory_space<vmem>>, vector<1x4x256xf32>
    %25 = vector.shape_cast %24 : vector<1x4x256xf32> to vector<4x256xf32>
    %26 = vector.shape_cast %23 : vector<4x256xf32> to vector<1x4x256xf32>
    tpu.vector_store %arg5[%c0_10, %c0_11, %c0_12], %26 {strides = array<i32>} : memref<1x4x256xf32, #tpu.memory_space<vmem>>, vector<1x4x256xf32>,
    return
  }
  func.func @transform_0(%arg0: i32, %arg1: i32) -> (i32, i32, i32) {
    %c0_i32 = arith.constant 0 : i32
    %c0_i32_0 = arith.constant 0 : i32
    return %arg0, %c0_i32, %arg1 : i32, i32, i32
  }
  func.func @transform_1(%arg0: i32, %arg1: i32) -> (i32, i32) {
    %c0_i32 = arith.constant 0 : i32
    %c0_i32_0 = arith.constant 0 : i32
    %c0_i32_1 = arith.constant 0 : i32
    return %c0_i32, %c0_i32_0 : i32, i32
  }
  func.func @transform_2(%arg0: i32, %arg1: i32) -> (i32, i32) {
    %c0_i32 = arith.constant 0 : i32
    %c0_i32_0 = arith.constant 0 : i32
    %c0_i32_1 = arith.constant 0 : i32
    return %c0_i32, %c0_i32_0 : i32, i32
  }
  func.func @transform_3(%arg0: i32, %arg1: i32) -> (i32, i32, i32) {
    %c0_i32 = arith.constant 0 : i32
    %c0_i32_0 = arith.constant 0 : i32
    return %arg0, %c0_i32, %arg1 : i32, i32, i32
  }
}

</mosaic_0001>

<bundles_post_ra>
// kernel: tpu_custom_call.1
= control target key start
LH: loop header
LB: loop body
LE: loop exit
PB: predicated region body
PF: predicated region fallthrough
CT: control target
= control target key end

     0   :  { %8 = vsyncpa [#allocation3], 0  ;;  %s785_s0 = inlined_call_operand.hbm [shape: f32[2,4,256], index: 0, kind: input, shape index: {}]   ;;  %s786_s1 = inlined_call_operand.vmem [shape: f32[4,1], index: 1, kind: input, shape index: {}]   ;;  %s787_s2 = inlined_call_operand.vmem [shape: f32[4,1], index: 2, kind: input, shape index: {}]   ;;  %s788_s3 = inlined_call_operand.hbm [shape: f32[2,4,256], index: 3, kind: output, shape index: {}]  }
   0x1   :  { %10 = vsyncpa [#allocation3 + $0x1], 0 }
   0x2   :  { %11 = vsyncpa [#allocation4], 0 }
   0x3   :  { %13 = vsyncpa [#allocation4 + $0x1], 0  ;;  %s649_s12 = smov 0   ;;  %s651_s13 = smov 0  }
   0x4   :  { %s653_s14 = smov 0   ;;  %s655_s15 = smov 0  }
   0x5   :  { %s657_s16 = smov 0   ;;  %s659_s17 = smov 0  }
   0x6 LB: > { %s423_s18 = sadd.s32 4294967295, %s624_s17   ;;  %s424_s19 = sadd.s32 4294967294, %s624_s17   ;;  %s624_s17 = sphi %s659_s17, %s19_s17   ;;  %s620_s16 = sphi %s657_s16, %s797_s16   ;;  %s616_s15 = sphi %s655_s15, %s796_s15   ;;  %s612_s14 = sphi %s653_s14, %s795_s14   ;;  %s608_s13 = sphi %s651_s13, %s794_s13   ;;  %s604_s12 = sphi %s649_s12, %s793_s12  }
   0x7   : > { %s31_s20 = sadd.s32 1, %s620_s16  ;;  %s40_s21 = sadd.s32 1, %s612_s14 }
   0x8   : > { %p33_p0 = scmp.ge.s32.totalorder %s31_s20, 2  ;;  %p47_p1 = scmp.ne.s32.totalorder %s612_s14, %s608_s13 }
   0x9   : > { %p48_p2 = scmp.eq.s32.totalorder %s624_s17, 0  ;;  %p53_p3 = scmp.ne.s32.totalorder %s608_s13, %s604_s12 }
   0xa   : > { %s799_s20 = smov (%p33_p0, %s31_s20), 0  ;;  %p54_p5 = scmp.eq.s32.totalorder %s423_s18, 0 }
   0xb   : > { %p690_p4 = por %p48_p2, %p47_p1  ;;  %s35_s23 = ssub.s32 %s620_s16, %s799_s20 }
   0xc   : > { %p121_p6 = scmp.eq.s32.totalorder %s423_s18, 1  ;;  %p38_p7 = scmp.eq.s32.totalorder %s35_s23, 0 }
   0xd   : > { %p696_p8 = por %p54_p5, %p53_p3  ;;  %p127_p10 = scmp.eq.s32.totalorder %s424_s19, 1 }
   0xe   : > { %p700_p9 = por %p121_p6, %p47_p1  ;;  %p426_p12 = scmp.ge.s32.totalorder %s624_s17, 2 }
   0xf   : > { %s705_s26 = scalar_select %p38_p7, %s612_s14, %s40_s21  }
  0x10   : > { %p707_p11 = por %p127_p10, %p53_p3  ;;  %p452_p13 = scmp.lt.s32.totalorder %s624_s17, 2 }
  0x11   : > { %s153_s28 = sand.u32 1, %s612_s14   ;;  %s438_s30 = sshll.u32 %s620_s16, 3 }
  0x12   : > { %s427_s29 = sshll.u32 %s153_s28, 3  ;;  %s164_s6 = scalar_lea.hbm %s785_s0, %s438_s30 }
  0x13   : > { %s157_s7 = scalar_lea.vmem [#allocation2], %s427_s29  ;;  %s166_s9 = sshll.u32 %s164_s6, 4  ;;  %s167_s9 = int_to_ptr.hbm [resolvable:$true] %s166_s9 }
  0x14   : > { %s168_s8 = sshll.u32 %s157_s7, 4  ;;  %p445_p0 = pnand %p452_p13, %p690_p4  ;;  %s169_s8 = int_to_ptr.vmem [resolvable:$true] %s168_s8 }
  0x15   : > { %p430_p1 = scmp.ge.s32.totalorder %s624_s17, 1  ;;  %p173_p2 = scmp.lt.s32.totalorder %s624_s17, 3 }
  0x16   : > { %s154_s10 = scalar_lea.sflag [#allocation3], %s153_s28 }
  0x17   : > { %447 = dma.hbm_to_vmem [thread:$0]  (!%p445_p0), %s167_s9, 128, %s169_s8, %s154_s10  }
  0x18   : > { %p174_p3 = pnand %p430_p1, %p173_p2 }
  0x19   : > { %s723_s11 = sand.u32 (!%p174_p3), 1, %s608_s13  }
  0x1a   : > { %177 = sbr.rel (%p174_p3) target bundleno = 164 (0xa4), region = 32  ;;  %s431_s18 = sshll.u32 (!%p174_p3), %s723_s11, 3 }
  0x1b   : > { %s180_s19 = scalar_lea.sflag (!%p174_p3), [#allocation3], %s723_s11  ;;  %s183_s21 = scalar_lea.vmem (!%p174_p3), [#allocation2], %s431_s18 }
  0x1f   : > { %595 = dma.done.wait (%p696_p8), %s180_s19, 128  }
  0x20   : > { %597 = vsyncadd (%p696_p8), %s180_s19, 4294967168  ;;  %v626_v0 = vmov 0   ;;  %v297_v1 = vld [vmem:[%s786_s1] sm:$0xf]  ;;  %v627_v2 = vmov 4.0   ;;  %v209_v5 = vld [vmem:[%s183_s21] sm:$0xff] }
  0x21   : > { %505 = vset.pattern.permute.xlu0 %v626_v0  ;;  %506 = vrcp.f32 %v627_v2  ;;  %v308_v3 = vld [vmem:[%s787_s2] sm:$0xf]  ;;  %211 = vst [vmem:[#allocation1] ss:$2 sm:$0xff] %v209_v5  ;;  %vm216_vm0 = vcmask 1043456   ;;  %s439_s24 = sshll.u32 %s616_s15, 3 }
  0x22   : > { %300 = vperm.xlu0 %505, %v297_v1   ;;  %s334_s5 = scalar_lea.hbm %s788_s3, %s439_s24  ;;  %s206_s6 = scalar_lea.vmem [#allocation5], %s431_s18 }
  0x23   : > { %s336_s7 = sshll.u32 %s206_s6, 4  ;;  %s338_s8 = sshll.u32 %s334_s5, 4  ;;  %s337_s7 = int_to_ptr.vmem [resolvable:$true] %s336_s7  ;;  %s339_s8 = int_to_ptr.hbm [resolvable:$true] %s338_s8 }
  0x24   : > { %s321_s9 = scalar_lea.sflag [#allocation4], %s723_s11  ;;  %s556_s10 = sshra.s32 %s339_s8, 4  ;;  %s557_s10 = int_to_ptr.hbm [resolvable:$true] %s556_s10 }
  0x25   : > { %s558_s15 = scalar_lea.hbm %s557_s10, 8  ;;  %s562_s18 = scalar_lea.hbm %s788_s3, 16 }
  0x26   : > { %p559_p4 = scmp.ne.s32.totalorder %s557_s10, %s558_s15  ;;  %p563_p7 = scmp.lt.s32.totalorder %s557_s10, %s788_s3 }
  0x27   : > { %v507_v4 = vpop.eup %506  ;;  %p564_p8 = scmp.lt.s32.totalorder %s562_s18, %s558_s15 }
  0x28   : > { %v232_v6 = vmul.f32 4.0, %v507_v4  ;;  %v213_v8 = vld.sshfl [vmem:[#allocation1 + $0x8] sm:$0xff pattern:$0x75316420]  ;;  %vm236_vm1 = vweird.f32 %v507_v4  ;;  %p560_p5 = pnand %p559_p4, %p700_p9 }
  0x29   : > { %v224_v9 = vsel %vm216_vm0, %v213_v8, 0.0  ;;  %v212_v10 = vld.sshfl [vmem:[#allocation1] sm:$0xff pattern:$0x75316420]  ;;  %p565_p10 = por %p564_p8, %p563_p7 }
  0x2a   : > { %311 = vperm.xlu0 %505, %v308_v3   ;;  %v233_v7 = vsub.f32 1.0, %v232_v6  ;;  %v225_v11 = vrot.slane %v224_v9, 4  ;;  %v217_v13 = vsel %vm216_vm0, %v212_v10, 0.0  ;;  %v628_v6 = vmov 839922192   ;;  %p561_p6 = pneg %p560_p5 }
  0x2b   : > { %v218_v14 = vrot.slane %v217_v13, 4 }
  0x2c   : > { %v234_v12 = vmul.f32 %v507_v4, %v233_v7  ;;  %v226_v15 = vadd.f32 %v225_v11, %v224_v9  ;;  %v303_v7 = vunpack.c.l.s4 %v628_v6  ;;  %p566_p13 = pnand %p565_p10, %p561_p6 }
  0x2d   : > { %v219_v16 = vadd.f32 %v218_v14, %v217_v13 }
  0x2e   : > { %v227_v17 = vrot.slane %v226_v15, 2  ;;  %v235_v18 = vadd.f32 %v507_v4, %v234_v12  ;;  %v304_v9 = vunpack.c.0.s8 %v303_v7 }
  0x2f   : > { %v220_v19 = vrot.slane %v219_v16, 2 }
  0x30   : > { %v228_v20 = vadd.f32 %v227_v17, %v226_v15  ;;  %v237_v23 = vsel %vm236_vm1, %v507_v4, %v235_v18 }
  0x31   : > { %v221_v21 = vadd.f32 %v220_v19, %v219_v16 }
  0x32   : > { %v229_v22 = vrot.slane %v228_v20, 1 }
  0x33   : > { %v222_v24 = vrot.slane %v221_v21, 1 }
  0x34   : > { %v230_v25 = vadd.f32 %v229_v22, %v228_v20 }
  0x35   : > { %v223_v26 = vadd.f32 %v222_v24, %v221_v21 }
  0x36   : > { %v239_v27 = vmul.f32 %v237_v23, %v230_v25 }
  0x37   : > { %v238_v28 = vmul.f32 %v237_v23, %v223_v26 }
  0x38   : > { %v242_v29 = vrot.slane %v239_v27, 4 }
  0x3a   : > { %v243_v30 = vsel %vm216_vm0, %v238_v28, %v242_v29 }
  0x3b   : > { %v245_v31 = vsub.f32 %v209_v5, %v243_v30 }
  0x3d   : > { %v246_v32 = vmul.f32 %v245_v31, %v245_v31 }
  0x3f   : > { %248 = vst [vmem:[#allocation1] ss:$2 sm:$0xff] %v246_v32 }
  0x46   : > { %v250_v33 = vld.sshfl [vmem:[#allocation1 + $0x8] sm:$0xff pattern:$0x75316420]  ;;  %v249_v35 = vld.sshfl [vmem:[#allocation1] sm:$0xff pattern:$0x75316420] }
  0x47   : > { %v260_v34 = vsel %vm216_vm0, %v250_v33, 0.0  ;;  %v253_v37 = vsel %vm216_vm0, %v249_v35, 0.0 }
  0x48   : > { %v261_v36 = vrot.slane %v260_v34, 4  ;;  %v254_v38 = vrot.slane %v253_v37, 4 }
  0x4a   : > { %v262_v39 = vadd.f32 %v261_v36, %v260_v34  ;;  %v255_v40 = vadd.f32 %v254_v38, %v253_v37 }
  0x4c   : > { %v263_v41 = vrot.slane %v262_v39, 2  ;;  %v256_v42 = vrot.slane %v255_v40, 2 }
  0x4e   : > { %v264_v43 = vadd.f32 %v263_v41, %v262_v39  ;;  %v257_v44 = vadd.f32 %v256_v42, %v255_v40 }
  0x50   : > { %v265_v45 = vrot.slane %v264_v43, 1  ;;  %v258_v46 = vrot.slane %v257_v44, 1 }
  0x52   : > { %v266_v47 = vadd.f32 %v265_v45, %v264_v43  ;;  %v259_v48 = vadd.f32 %v258_v46, %v257_v44 }
  0x54   : > { %v268_v49 = vmul.f32 %v266_v47, %v237_v23  ;;  %v267_v50 = vmul.f32 %v259_v48, %v237_v23 }
  0x56   : > { %v270_v51 = vadd.f32 1e-06, %v268_v49  ;;  %v269_v52 = vadd.f32 1e-06, %v267_v50 }
  0x58   : > { %508 = vrsqrt.f32 %v270_v51  ;;  %vm287_vm2 = vweird.f32 %v270_v51  ;;  %vm277_vm5 = vweird.f32 %v269_v52 }
  0x59   : > { %510 = vrsqrt.f32 %v269_v52 }
  0x5e   : > { %v509_v53 = vpop.eup %508 }
  0x5f   : > { %v282_v54 = vmul.f32 %v509_v53, %v270_v51  ;;  %v511_v55 = vpop.eup %510  ;;  %vm288_vm3 = vweird.f32 %v509_v53 }
  0x60   : > { %v272_v56 = vmul.f32 %v511_v55, %v269_v52  ;;  %vm289_vm4 = vmor %vm287_vm2, %vm288_vm3  ;;  %vm278_vm6 = vweird.f32 %v511_v55 }
  0x61   : > { %v283_v57 = vmul.f32 %v509_v53, %v282_v54  ;;  %vm279_vm7 = vmor %vm277_vm5, %vm278_vm6 }
  0x62   : > { %v273_v58 = vmul.f32 %v511_v55, %v272_v56 }
  0x63   : > { %v284_v59 = vmul.f32 0.5, %v283_v57 }
  0x64   : > { %v274_v60 = vmul.f32 0.5, %v273_v58 }
  0x65   : > { %v285_v61 = vsub.f32 1.5, %v284_v59 }
  0x66   : > { %v275_v62 = vsub.f32 1.5, %v274_v60 }
  0x67   : > { %v286_v63 = vmul.f32 %v509_v53, %v285_v61 }
  0x68   : > { %v276_v0 = vmul.f32 %v511_v55, %v275_v62 }
  0x69   : > { %v290_v1 = vsel %vm289_vm4, %v509_v53, %v286_v63 }
  0x6a   : > { %v293_v2 = vrot.slane %v290_v1, 4  ;;  %v280_v3 = vsel %vm279_vm7, %v511_v55, %v276_v0 }
  0x6c   : > { %v294_v4 = vsel %vm216_vm0, %v280_v3, %v293_v2 }
  0x6d   : > { %v296_v5 = vmul.f32 %v294_v4, %v245_v31 }
  0x94   : > { %v301_v8 = vpop.permute.xlu0 %300 }
  0x95   : > { %v305_v10 = vperm.slane %v301_v8, %v304_v9 }
  0x97   : > { %v307_v12 = vmul.f32 %v305_v10, %v296_v5 }
  0x9c   : > { %v312_v11 = vpop.permute.xlu0 %311 }
  0x9d   : > { %v316_v13 = vperm.slane %v312_v11, %v304_v9 }
  0x9f   : > { %v318_v14 = vadd.f32 %v316_v13, %v307_v12 }
  0xa1   : > { %319 = vst [vmem:[%s206_s6] sm:$0xff] %v318_v14 }
  0xa2   : > { %569 = shalt.err (!%p566_p13)
}
  0xa3   : > { %442 = dma.vmem_to_hbm [thread:$0]  (%p700_p9), %s337_s7, 128, %s339_s8, %s321_s9  }
  0xa4 PF: > { %s350_s11 = sand.u32 1, %s604_s12   ;;  %p449_p0 = pnand %p426_p12, %p707_p11 }
  0xa5   : > { %s351_s28 = scalar_lea.sflag [#allocation4], %s350_s11 }
  0xa6   : > { %p450_p1 = pneg %p449_p0 }
  0xa8   : > { %599 = dma.done.wait (%p450_p1), %s351_s28, 128  }
  0xa9   : > { %601 = vsyncadd (%p450_p1), %s351_s28, 4294967168  ;;  %s19_s17 = sadd.s32 1, %s624_s17   ;;  %s793_s12 = smov %s608_s13 }
  0xaa   : > { %p16_p2 = scmp.ge.s32.totalorder %s19_s17, 4   ;;  %s794_s13 = smov %s612_s14 }
  0xab   : > { %s795_s14 = smov %s705_s26  ;;  %s796_s15 = smov %s620_s16 }
  0xac   : > { %s797_s16 = smov %s799_s20  ;;  %18 = sbr.rel (!%p16_p2) target bundleno = 6 (0x6), region = 77 }
  0xb1   :  { %357 = vsyncpa [#allocation3], 1 }
  0xb2   :  { %359 = vsyncpa [#allocation3 + $0x1], 1 }
  0xb3   :  { %360 = vsyncpa [#allocation4], 1 }
  0xb4   :  { %362 = vsyncpa [#allocation4 + $0x1], 1 }

</bundles_post_ra>
